<compile_context>
chip_gen: v7x
topology: tpu7x:2x2x1
jax: 0.10.0
libtpu: 0.0.40
codegen_flags: <defaults>
</compile_context>

<pallas_src>
import numpy as np
import jax
import jax.numpy as jnp
from jax.experimental import pallas as pl
from jax.experimental.pallas import tpu as pltpu


def make_interp_matrix_np(out_size: int, in_size: int) -> np.ndarray:
    """Row-interpolation matrix for bilinear upsampling, align_corners=False
    (matches PyTorch, including the negative-src clamp)."""
    scale = out_size / in_size
    dst = np.arange(out_size, dtype=np.float64)
    src = (dst + 0.5) / scale - 0.5
    src = np.maximum(src, 0.0)
    idx0 = np.minimum(np.floor(src).astype(np.int64), in_size - 1)
    idx1 = np.minimum(idx0 + 1, in_size - 1)
    frac = src - idx0
    w = np.zeros((out_size, in_size), dtype=np.float64)
    rows = np.arange(out_size)
    w[rows, idx0] += 1.0 - frac
    w[rows, idx1] += frac
    return w.astype(np.float32)


def _choose_tile(total: int, max_tile: int, align: int) -> int:
    """Largest tile <= max_tile that is `align`-aligned (or the full extent)."""
    if total <= max_tile:
        return total
    cap = max(align, (max_tile // align) * align)
    for t in range(cap, 0, -align):
        if total % t == 0:
            return t
    return cap  # non-dividing: Pallas masks the ragged final block


def _device_caps():
    """Per-generation caps: v7x has 64 MiB VMEM per TensorCore -> smaller tiles."""
    kind = ""
    try:
        kind = jax.devices()[0].device_kind.lower()
    except Exception:
        pass
    if "v7" in kind:
        return {"hw_tile_max": 4096, "vmem_cap": 44 * 1024 * 1024}
    return {"hw_tile_max": 8192, "vmem_cap": 80 * 1024 * 1024}


def upsample_kernel(x_ref, wt_ref, o_ref):
    # x_ref : [1, c_tile, N]     MXU-ready LHS tile (compute dtype, e.g. bf16)
    # wt_ref: [N, hw_tile]       kron(Wh, Ww)^T row-tile (resident across b/c)
    # o_ref : [1, c_tile, hw_tile]
    out = jnp.dot(x_ref[0], wt_ref[...], preferred_element_type=jnp.float32)
    o_ref[0] = out.astype(o_ref.dtype)


def upsample_forward(x, image_size: int, patch_size, *,
                     c_tile_max: int = 256, hw_tile_max: int | None = None,
                     compute_dtype=jnp.bfloat16, out_dtype=None):
    """x: [B, p1*p2, C]  ->  [B, C, image_size, image_size]  (NCHW, as the module)."""
    p1 = image_size // patch_size[0]
    p2 = image_size // patch_size[1]
    B, N, C = x.shape
    assert N == p1 * p2

    H_out = p1 * patch_size[0]
    W_out = p2 * patch_size[1]
    HW = H_out * W_out
    out_dtype = x.dtype if out_dtype is None else out_dtype

    caps = _device_caps()
    if hw_tile_max is None:
        hw_tile_max = caps["hw_tile_max"]

    # Constant interpolation operator, built in numpy (avoids XLA constant
    # folding of a potentially large [N, HW] array), fed to the MXU in bf16.
    wh = make_interp_matrix_np(H_out, p1)              # [H_out, p1]
    ww = make_interp_matrix_np(W_out, p2)              # [W_out, p2]
    wt = jnp.asarray(np.kron(wh, ww).T, dtype=compute_dtype)   # [N, HW]
    # TODO(synk): for very large images generate the wt tile in-kernel from
    # broadcasted_iota (each column has <=4 nonzeros) instead of streaming it.

    # One cheap wrapper-side transpose+cast (input is patch^2-x smaller than
    # the output) so the kernel needs no per-step XLU transpose.
    x_t = jnp.swapaxes(x, 1, 2).astype(compute_dtype)  # [B, C, N]

    c_tile = _choose_tile(C, c_tile_max, 128)           # full C or x128
    hw_tile = _choose_tile(HW, hw_tile_max, 128)        # lane-dense output tile
    num_c = pl.cdiv(C, c_tile)
    num_hw = pl.cdiv(HW, hw_tile)

    # VMEM budget from the actual (double-buffered) block footprint + headroom.
    csize = np.dtype(compute_dtype).itemsize
    osize = np.dtype(out_dtype).itemsize
    block_bytes = (c_tile * N * csize) + (N * hw_tile * csize) + (c_tile * hw_tile * osize)
    vmem_limit = int(min(max(3 * block_bytes + (8 << 20), 32 << 20), caps["vmem_cap"]))

    out_flat = pl.pallas_call(
        upsample_kernel,
        out_shape=jax.ShapeDtypeStruct((B, C, HW), out_dtype),
        grid_spec=pltpu.PrefetchScalarGridSpec(
            num_scalar_prefetch=0,
            # hw outermost: the wt row-tile is DMA'd once per hw tile and stays
            # VMEM-resident across all (b, c) steps; megacore splits on hw so
            # wt is read once in aggregate.
            grid=(num_hw, B, num_c),
            in_specs=[
                pl.BlockSpec((1, c_tile, N), lambda hi, b, ci: (b, ci, 0)),
                pl.BlockSpec((N, hw_tile), lambda hi, b, ci: (0, hi)),
            ],
            out_specs=pl.BlockSpec((1, c_tile, hw_tile),
                                   lambda hi, b, ci: (b, ci, hi)),
        ),
        compiler_params=pltpu.CompilerParams(
            dimension_semantics=("parallel", "parallel", "parallel"),
            vmem_limit_bytes=vmem_limit),
    )(x_t, wt)

    # Free reshape (splits the trailing dim only) to the module's NCHW output.
    return out_flat.reshape(B, C, H_out, W_out)


if __name__ == "__main__":
    # Small shapes consistent with the module:
    #   image_size=16, patch_size=(4,4)  ->  p1=p2=4, seq N=16
    image_size = 16
    patch_size = (4, 4)
    B, C = 2, 4
    p1 = image_size // patch_size[0]
    p2 = image_size // patch_size[1]

    key = jax.random.PRNGKey(0)
    x = jax.random.normal(key, (B, p1 * p2, C), dtype=jnp.float32)

    out = upsample_forward(x, image_size, patch_size)
    out = jax.block_until_ready(out)
    assert out.shape == (B, C, image_size, image_size)

    # References.
    wh = jnp.asarray(make_interp_matrix_np(image_size, p1))
    ww = jnp.asarray(make_interp_matrix_np(image_size, p2))

    # (a) Exact-plumbing reference: same bf16 rounding of inputs, f32 accumulation.
    wt_ref = jnp.kron(wh, ww).T.astype(jnp.bfloat16).astype(jnp.float32)        # [N, HW]
    x_t_ref = jnp.swapaxes(x, 1, 2).astype(jnp.bfloat16).astype(jnp.float32)     # [B, C, N]
    ref_bf16 = jnp.einsum('bcn,nh->bch', x_t_ref, wt_ref).reshape(
        B, C, image_size, image_size)
    err_a = float(jnp.max(jnp.abs(out - ref_bf16)))
    assert jnp.allclose(out, ref_bf16, atol=2e-3, rtol=2e-3), err_a

    # (b) Semantic reference: full-f32 bilinear (what nn.Upsample computes).
    x_img = jnp.transpose(x.reshape(B, p1, p2, C), (0, 3, 1, 2))
    ref_f32 = jnp.einsum('oh,bchw,pw->bcop', wh, x_img, ww)
    err_b = float(jnp.max(jnp.abs(out - ref_f32)))
    assert jnp.allclose(out, ref_f32, atol=5e-2, rtol=5e-2), err_b

    print("KERNEL_OK")
</pallas_src>

<mosaic_0001>
module attributes {stable_mosaic.version = 11 : i64} {
  func.func @upsample_kernel(%arg0: i32, %arg1: i32, %arg2: i32, %arg3: memref<1x4x16xbf16, #tpu.memory_space<vmem>>, %arg4: memref<16x256xbf16, #tpu.memory_space<vmem>>, %arg5: memref<1x4x256xf32, #tpu.memory_space<vmem>>) attributes {dimension_semantics = [#tpu.dimension_semantics<parallel>, #tpu.dimension_semantics<parallel>, #tpu.dimension_semantics<parallel>], iteration_bounds = array<i64: 1, 2, 1>, scalar_prefetch = 0 : i64, scratch_operands = 0 : i64, tpu.core_type = #tpu.core_type<tc>, window_params = [{transform_indices = @transform_0, window_bounds = array<i64: 1, 4, 16>}, {transform_indices = @transform_1, window_bounds = array<i64: 16, 256>}, {transform_indices = @transform_2, window_bounds = array<i64: 1, 4, 256>}]} {
    %c0 = arith.constant 0 : index
    %c0_0 = arith.constant 0 : index
    %c0_1 = arith.constant 0 : index
    %0 = vector.load %arg3[%c0, %c0_0, %c0_1] : memref<1x4x16xbf16, #tpu.memory_space<vmem>>, vector<1x4x16xbf16>
    %1 = vector.shape_cast %0 : vector<1x4x16xbf16> to vector<4x16xbf16>
    %c0_2 = arith.constant 0 : index
    %c0_3 = arith.constant 0 : index
    %2 = vector.load %arg4[%c0_2, %c0_3] : memref<16x256xbf16, #tpu.memory_space<vmem>>, vector<16x256xbf16>
    %cst = arith.constant dense<0.000000e+00> : vector<4x256xf32>
    %3 = tpu.matmul %1, %2, %cst {dimension_numbers = #tpu.dot_dimension_numbers<[1], [0], [0], [1], [0, 0, 1, 1], [], []>} : vector<4x16xbf16>, vector<16x256xbf16>, vector<4x256xf32> -> vector<4x256xf32>
    %c0_4 = arith.constant 0 : index
    %c0_5 = arith.constant 0 : index
    %c0_6 = arith.constant 0 : index
    %4 = vector.load %arg5[%c0_4, %c0_5, %c0_6] : memref<1x4x256xf32, #tpu.memory_space<vmem>>, vector<1x4x256xf32>
    %5 = vector.shape_cast %4 : vector<1x4x256xf32> to vector<4x256xf32>
    %6 = vector.shape_cast %3 : vector<4x256xf32> to vector<1x4x256xf32>
    tpu.vector_store %arg5[%c0_4, %c0_5, %c0_6], %6 {strides = array<i32>} : memref<1x4x256xf32, #tpu.memory_space<vmem>>, vector<1x4x256xf32>,
    return
  }
  func.func @transform_0(%arg0: i32, %arg1: i32, %arg2: i32) -> (i32, i32, i32) {
    %c0_i32 = arith.constant 0 : i32
    %c0_i32_0 = arith.constant 0 : i32
    return %arg1, %arg2, %c0_i32 : i32, i32, i32
  }
  func.func @transform_1(%arg0: i32, %arg1: i32, %arg2: i32) -> (i32, i32) {
    %c0_i32 = arith.constant 0 : i32
    %c0_i32_0 = arith.constant 0 : i32
    return %c0_i32, %arg0 : i32, i32
  }
  func.func @transform_2(%arg0: i32, %arg1: i32, %arg2: i32) -> (i32, i32, i32) {
    %c0_i32 = arith.constant 0 : i32
    return %arg1, %arg2, %arg0 : i32, i32, i32
  }
}

</mosaic_0001>

<bundles_post_ra>
// kernel: tpu_custom_call.1
= control target key start
LH: loop header
LB: loop body
LE: loop exit
PB: predicated region body
PF: predicated region fallthrough
CT: control target
= control target key end

     0   :  { %7 = vsyncpa [#allocation3], 0  ;;  %s873_s0 = inlined_call_operand.hbm [shape: bf16[2,4,16], index: 0, kind: input, shape index: {}]   ;;  %s874_s1 = inlined_call_operand.hbm [shape: bf16[16,256], index: 1, kind: input, shape index: {}]   ;;  %s875_s2 = inlined_call_operand.hbm [shape: f32[2,4,256], index: 2, kind: output, shape index: {}]  }
   0x1   :  { %9 = vsyncpa [#allocation3 + $0x1], 0 }
   0x2   :  { %10 = vsyncpa [#allocation6], 0 }
   0x3   :  { %11 = vsyncpa [#allocation4], 0 }
   0x4   :  { %13 = vsyncpa [#allocation4 + $0x1], 0  ;;  %s658_s9 = smov 0   ;;  %s660_s10 = smov 0  }
   0x5   :  { %s662_s11 = smov 0   ;;  %s664_s12 = smov 0  }
   0x6   :  { %s666_s13 = smov 0   ;;  %s668_s14 = smov 0  }
   0x7 LB: > { %s392_s15 = sadd.s32 4294967295, %s635_s14   ;;  %s393_s16 = sadd.s32 4294967294, %s635_s14   ;;  %s635_s14 = sphi %s668_s14, %s19_s14   ;;  %s631_s13 = sphi %s666_s13, %s899_s13   ;;  %s627_s12 = sphi %s664_s12, %s898_s12   ;;  %s623_s11 = sphi %s662_s11, %s897_s11   ;;  %s619_s10 = sphi %s660_s10, %s896_s10   ;;  %s615_s9 = sphi %s658_s9, %s895_s9  }
   0x8   : > { %p60_p0 = scmp.ne.s32.totalorder %s619_s10, %s615_s9  ;;  %p692_p1 = scmp.eq.s32.totalorder %s392_s15, 0 }
   0x9   : > { %p696_p2 = scmp.eq.s32.totalorder %s392_s15, 1  ;;  %p120_p3 = scmp.eq.s32.totalorder %s393_s16, 1 }
   0xa   : > { %s880_s17 = scalar_select %p692_p1, 1, 0 }
   0xb   : > { %s881_s18 = scalar_select %p696_p2, 1, 0 }
   0xc   : > { %p702_p4 = por %p692_p1, %p60_p0  ;;  %p394_p5 = scmp.ge.s32.totalorder %s635_s14, 1 }
   0xd   : > { %p707_p6 = por %p120_p3, %p60_p0  ;;  %p127_p7 = scmp.lt.s32.totalorder %s635_s14, 3 }
   0xe   : > { %s882_s19 = scalar_select %p702_p4, 1, 0 }
   0xf   : > { %s883_s20 = scalar_select %p707_p6, 1, 0 }
  0x10   : > { %p712_p8 = pnand %p394_p5, %p127_p7  ;;  %s637_s22 = smov [#allocation5]  }
  0x11   : > { %s142_s23 = sshll.u32 %s637_s22, 4  ;;  %s34_s25 = sadd.s32 1, %s631_s13  ;;  %s143_s23 = int_to_ptr.vmem [resolvable:$true] %s142_s23 }
  0x12   : > { %s884_s21 = scalar_select %p712_p8, 1, 0 }
  0x13   : > { %p420_p9 = pneg %p712_p8  ;;  %s491_s28 = scalar_lea.hbm %s874_s1, 256 }
  0x14   : > { %p492_p12 = scmp.ne.s32.totalorder %s874_s1, %s491_s28  ;;  %p498_p5 = scmp.lt.u32.totalorder %s491_s28, %s874_s1 }
  0x15   : > { %p721_p11 = pnand %p420_p9, %p692_p1 }
  0x17   : > { %p493_p13 = pneg %p721_p11 }
  0x19   : > { %p494_p0 = pnand %p493_p13, %p492_p12 }
  0x1b   : > { %p495_p3 = pneg %p494_p0 }
  0x1d   : > { %p500_p7 = pnand %p498_p5, %p495_p3 }
  0x1f   : > { %503 = shalt.err (!%p500_p7)
}
  0x20   : > { %s504_s5 = scalar_lea.vmem %s143_s23, 256  ;;  %p512_p1 = scmp.lt.s32.totalorder %s143_s23, %s143_s23 }
  0x21   : > { %p505_p9 = scmp.ne.s32.totalorder %s143_s23, %s504_s5  ;;  %p513_p4 = scmp.lt.s32.totalorder %s504_s5, %s504_s5 }
  0x23   : > { %p507_p10 = pnand %p505_p9, %p493_p13  ;;  %p514_p8 = por %p513_p4, %p512_p1 }
  0x25   : > { %p508_p6 = pneg %p507_p10 }
  0x27   : > { %p515_p2 = pnand %p514_p8, %p508_p6 }
  0x29   : > { %518 = shalt.err (!%p515_p2)
}
  0x2a   : > { %s638_s6 = smov 128   ;;  %s639_s7 = smov 8  }
  0x2b   : > { %423 = dma.hbm_to_vmem [thread:$0]  (!%p721_p11), %s874_s1, 256, %s143_s23, [#allocation6], %s638_s6, %s638_s6, %s639_s7  }
  0x2c   : > { %p36_p1 = scmp.ge.s32.totalorder %s34_s25, 2  ;;  %s47_s16 = sadd.s32 1, %s623_s11 }
  0x2d   : > { %p54_p2 = scmp.ne.s32.totalorder %s623_s11, %s619_s10  ;;  %p55_p4 = scmp.eq.s32.totalorder %s635_s14, 0 }
  0x2e   : > { %s901_s25 = smov (%p36_p1, %s34_s25), 0  ;;  %p887_p8 = scmp.ne.s32.totalorder %s881_s18, 0 }
  0x2f   : > { %p748_p6 = por %p55_p4, %p54_p2  ;;  %s42_s24 = ssub.s32 %s631_s13, %s901_s25 }
  0x30   : > { %p754_p10 = por %p887_p8, %p54_p2  ;;  %p433_p12 = scmp.lt.s32.totalorder %s635_s14, 2 }
  0x31   : > { %p45_p11 = scmp.eq.s32.totalorder %s42_s24, 0  ;;  %s156_s23 = sand.u32 1, %s623_s11  }
  0x32   : > { %s397_s27 = sshll.u32 %s156_s23, 1  ;;  %s398_s29 = sshll.u32 %s631_s13, 5 }
  0x33   : > { %s763_s28 = scalar_select %p45_p11, %s623_s11, %s47_s16  }
  0x34   : > { %s769_s4 = scalar_lea.hbm %s873_s0, %s398_s29  ;;  %s160_s18 = scalar_lea.vmem [#allocation2], %s397_s27 }
  0x35   : > { %s168_s5 = sshll.u32 %s160_s18, 4  ;;  %p775_p13 = pnand %p433_p12, %p748_p6  ;;  %s771_s5 = int_to_ptr.vmem [resolvable:$true] %s168_s5 }
  0x36   : > { %s157_s7 = scalar_lea.sflag [#allocation3], %s156_s23  ;;  %s519_s8 = scalar_lea.hbm %s769_s4, 32 }
  0x37   : > { %p520_p0 = scmp.ne.s32.totalorder %s769_s4, %s519_s8  ;;  %p521_p3 = pneg %p775_p13 }
  0x38   : > { %s524_s24 = scalar_lea.hbm %s873_s0, 64  ;;  %p525_p9 = scmp.lt.u32.totalorder %s769_s4, %s873_s0 }
  0x39   : > { %p522_p5 = pnand %p521_p3, %p520_p0  ;;  %p526_p1 = scmp.lt.u32.totalorder %s524_s24, %s519_s8 }
  0x3a   : > { %p528_p4 = scmp.lt.u32.totalorder %s519_s8, %s769_s4 }
  0x3b   : > { %p523_p7 = pneg %p522_p5  ;;  %p527_p2 = por %p526_p1, %p525_p9 }
  0x3d   : > { %p529_p6 = por %p528_p4, %p527_p2 }
  0x3f   : > { %p530_p8 = pnand %p529_p6, %p523_p7 }
  0x41   : > { %533 = shalt.err (!%p530_p8)
}
  0x42   : > { %s534_s23 = scalar_lea.vmem %s771_s5, 32  ;;  %s640_s29 = smov [#allocation2]  }
  0x43   : > { %p535_p12 = scmp.ne.s32.totalorder %s771_s5, %s534_s23  ;;  %s539_s30 = sshll.u32 %s640_s29, 4  ;;  %s540_s30 = int_to_ptr.vmem [resolvable:$false] %s539_s30 }
  0x44   : > { %s541_s3 = scalar_lea.vmem %s540_s30, 64  ;;  %p542_p5 = scmp.lt.s32.totalorder %s771_s5, %s540_s30 }
  0x45   : > { %p537_p11 = pnand %p535_p12, %p521_p3  ;;  %p543_p9 = scmp.lt.s32.totalorder %s541_s3, %s534_s23 }
  0x47   : > { %p538_p0 = pneg %p537_p11  ;;  %p544_p1 = por %p543_p9, %p542_p5 }
  0x49   : > { %p545_p2 = pnand %p544_p1, %p538_p0 }
  0x4b   : > { %548 = shalt.err (!%p545_p2)
}
  0x4c   : > { %427 = dma.hbm_to_vmem [thread:$0]  (!%p775_p13), %s769_s4, 32, %s771_s5, %s157_s7  }
  0x4d   : > { %p890_p7 = scmp.ne.s32.totalorder %s884_s21, 0 }
  0x4e   : > { %s807_s18 = sand.u32 (!%p890_p7), 1, %s619_s10   ;;  %p891_p3 = scmp.ne.s32.totalorder (!%p890_p7), %s882_s19, 0 }
  0x4f   : > { %177 = sbr.rel (%p890_p7) target bundleno = 324 (0x144), region = 28  ;;  %s400_s8 = sshll.u32 (!%p890_p7), %s807_s18, 1 }
  0x50   : > { %s180_s15 = scalar_lea.sflag (!%p890_p7), [#allocation3], %s807_s18  ;;  %s183_s16 = scalar_lea.vmem (!%p890_p7), [#allocation2], %s400_s8 }
  0x56   : > { %602 = dma.done.wait (%p891_p3), %s180_s15, 32  }
  0x57   : > { %604 = vsyncadd (%p891_p3), %s180_s15, 4294967264  ;;  %p892_p4 = scmp.ne.s32.totalorder %s880_s17, 0 }
  0x59   : > { %606 = dma.done.wait (%p892_p4), [#allocation6], 256  }
  0x5a   : > { %608 = vsyncadd (%p892_p4), [#allocation6], 4294967040  ;;  %v641_v0 = vmov 0   ;;  %v488_v1 = vld [vmem:[#allocation5 + $0x4] ss:$8 sps:$4 sm:$0xff]   ;;  %vm224_vm0 = vcmask 130048  }
  0x5b   : > { %260 = vmatprep.mubr.bf16.mxu0 %v641_v0  ;;  %v490_v2 = vld [vmem:[#allocation5] ss:$8 sps:$4 sm:$0xff]   ;;  %228 = vmatprep.subr.bf16.mxu0 %v488_v1  ;;  %v211_v3 = vld [vmem:[%s183_s16] sm:$0x3]  ;;  %s402_s19 = sshll.u32 %s807_s18, 3  ;;  %s411_s21 = sshll.u32 %s627_s12, 7 }
  0x5c   : > { %229 = vmatpush1.bf16.msra.mxu0 %v490_v2  ;;  %s207_s4 = scalar_lea.vmem [#allocation7], %s402_s19  ;;  %s824_s7 = scalar_lea.hbm %s875_s2, %s411_s21 }
  0x5d   : > { %s293_s5 = sshll.u32 %s207_s4, 4  ;;  %s275_s24 = scalar_lea.sflag [#allocation4], %s807_s18  ;;  %s826_s5 = int_to_ptr.vmem [resolvable:$true] %s293_s5 }
  0x5e   : > { %s549_s12 = scalar_lea.vmem %s826_s5, 128  ;;  %s642_s22 = smov [#allocation7]  }
  0x5f   : > { %405 = vmatmul.mubr.msk.bf16.vlgmr.msra.gmra.mrb[0].mxu0 %vm224_vm0, %v211_v3  ;;  %p550_p13 = scmp.ne.s32.totalorder %s826_s5, %s549_s12  ;;  %s553_s27 = sshll.u32 %s642_s22, 4  ;;  %s554_s27 = int_to_ptr.vmem [resolvable:$false] %s553_s27 }
  0x60   : > { %s555_s23 = scalar_lea.vmem %s554_s27, 256  ;;  %p556_p12 = scmp.lt.s32.totalorder %s826_s5, %s554_s27 }
  0x61   : > { %p551_p6 = pnand %p550_p13, %p754_p10  ;;  %p557_p11 = scmp.lt.s32.totalorder %s555_s23, %s549_s12 }
  0x63   : > { %p552_p8 = pneg %p551_p6  ;;  %p558_p0 = por %p557_p11, %p556_p12 }
  0x65   : > { %p559_p5 = pnand %p558_p0, %p552_p8 }
 0x132   : > { %v262_v4 = vpop.f32.mrb[0].mxu0 }
 0x133   : > { %v264_v5 = vpop.f32.mrb[1].mxu0 }
 0x134   : > { %v271_v6 = vcombine.low %v262_v4, %v264_v5  ;;  %v266_v7 = vpop.f32.mrb[2].mxu0 }
 0x135   : > { %v267_v8 = vpop.f32.mrb[3].mxu0 }
 0x136   : > { %273 = vst [vmem:[%s207_s4] sm:$0xff] %v271_v6 }
 0x137   : > { %562 = shalt.err (!%p559_p5)
}
 0x138   : > { %s563_s29 = scalar_lea.hbm %s824_s7, 128  ;;  %s567_s18 = scalar_lea.hbm %s875_s2, 256 }
 0x139   : > { %p564_p9 = scmp.ne.s32.totalorder %s824_s7, %s563_s29  ;;  %p568_p7 = scmp.lt.u32.totalorder %s824_s7, %s875_s2 }
 0x13a   : > { %p569_p3 = scmp.lt.u32.totalorder %s567_s18, %s563_s29  ;;  %p571_p13 = scmp.lt.u32.totalorder %s563_s29, %s824_s7 }
 0x13b   : > { %p565_p1 = pnand %p564_p9, %p754_p10 }
 0x13c   : > { %p570_p4 = por %p569_p3, %p568_p7 }
 0x13d   : > { %p566_p2 = pneg %p565_p1 }
 0x13e   : > { %p572_p6 = por %p571_p13, %p570_p4 }
 0x140   : > { %p573_p8 = pnand %p572_p6, %p566_p2 }
 0x142   : > { %576 = shalt.err (!%p573_p8)
}
 0x143   : > { %418 = dma.vmem_to_hbm [thread:$0]  (%p754_p10), %s826_s5, 128, %s824_s7, %s275_s24  }
 0x144 PF: > { %s305_s16 = sand.u32 1, %s615_s9   ;;  %p893_p12 = scmp.ne.s32.totalorder %s883_s20, 0 }
 0x145   : > { %p894_p11 = scmp.ge.s32.totalorder %s635_s14, 2  ;;  %s306_s19 = scalar_lea.sflag [#allocation4], %s305_s16 }
 0x147   : > { %p429_p0 = pnand %p894_p11, %p893_p12 }
 0x149   : > { %610 = dma.done.wait (!%p429_p0), %s306_s19, 128  }
 0x14a   : > { %612 = vsyncadd (!%p429_p0), %s306_s19, 4294967168  ;;  %s19_s14 = sadd.s32 1, %s635_s14   ;;  %s895_s9 = smov %s619_s10 }
 0x14b   : > { %p16_p5 = scmp.ge.s32.totalorder %s19_s14, 4   ;;  %s896_s10 = smov %s623_s11 }
 0x14c   : > { %s897_s11 = smov %s763_s28  ;;  %s898_s12 = smov %s631_s13 }
 0x14d   : > { %s899_s13 = smov %s901_s25  ;;  %18 = sbr.rel (!%p16_p5) target bundleno = 7 (0x7), region = 78 }
 0x154   :  { %311 = vsyncpa [#allocation3], 1 }
 0x155   :  { %313 = vsyncpa [#allocation3 + $0x1], 1 }
 0x156   :  { %314 = vsyncpa [#allocation6], 1 }
 0x157   :  { %315 = vsyncpa [#allocation4], 1 }
 0x158   :  { %317 = vsyncpa [#allocation4 + $0x1], 1 }

</bundles_post_ra>
